<compile_context>
chip_gen: v6e
topology: v6e:2x2x1
jax: 0.10.0
libtpu: 0.0.40
codegen_flags: <defaults>
</compile_context>

<pallas_src>
import jax
import jax.numpy as jnp
from jax import lax
from jax.experimental import pallas as pl
from jax.experimental.pallas import tpu as pltpu


# ----------------------------------------------------------------------------
# Kernel 1: single-layer GRU recurrence with packed-sequence masking.
# ----------------------------------------------------------------------------
def gru_recurrence_kernel(x_ref, h0_ref, wih_ref, whh_ref, bias_ref, bhn_ref,
                          len_ref, hn_ref, last_ref):
    """x_ref    : (T, B, E)  bf16 time-major embedded inputs
       h0_ref   : (1, B, H)  f32 initial hidden state
       wih_ref  : (E, 3H)    bf16  W_ih^T, gate order [r|z|n]
       whh_ref  : (H, 3H)    bf16  W_hh^T, gate order [r|z|n]
       bias_ref : (1, 3H)    f32   [b_ir+b_hr | b_iz+b_hz | b_in]
       bhn_ref  : (1, H)     f32   b_hn (added inside the r*(...) term)
       len_ref  : (B, 1)     int32 valid sequence lengths
       hn_ref   : (1, B, H)  f32   final hidden state
       last_ref : (B, H)     bf16  pad_packed output[-1] (input to projection)
    """
    T, B, E = x_ref.shape
    H = h0_ref.shape[-1]
    lens = len_ref[...]                                    # (B, 1) int32

    # --- hoisted input projection: one matmul for all timesteps -------------
    x_all = x_ref[...].reshape(T * B, E)                   # bf16
    gi_all = jnp.dot(x_all, wih_ref[...],
                     preferred_element_type=jnp.float32) + bias_ref[...]
    # gi_all: (T*B, 3H) f32, r/z thirds already carry (b_ih + b_hh)

    b_hn = bhn_ref[...]                                    # (1, H) f32
    h = h0_ref[0].astype(jnp.float32)                      # (B, H) f32 carry

    # --- fully unrolled recurrence (T is small & static) --------------------
    for t in range(T):
        gi = gi_all[t * B:(t + 1) * B]                     # (B, 3H) static slice
        gh = jnp.dot(h.astype(whh_ref.dtype), whh_ref[...],
                     preferred_element_type=jnp.float32)   # (B, 3H) f32
        i_r, i_z, i_n = gi[:, 0:H], gi[:, H:2 * H], gi[:, 2 * H:3 * H]
        h_r, h_z, h_n = gh[:, 0:H], gh[:, H:2 * H], gh[:, 2 * H:3 * H]
        r = jax.nn.sigmoid(i_r + h_r)                      # f32 gate math
        z = jax.nn.sigmoid(i_z + h_z)
        n = jnp.tanh(i_n + r * (h_n + b_hn))
        h_new = (1.0 - z) * n + z * h
        # packed-sequence semantics: no update past a sequence's valid length
        h = jnp.where(t < lens, h_new, h)

    hn_ref[0] = h.astype(hn_ref.dtype)
    # pad_packed_sequence pads with zeros, so output[-1] is zero for any
    # sequence shorter than the max length T.
    last = jnp.where(lens == T, h, jnp.zeros_like(h))      # (B, H)
    last_ref[...] = last.astype(last_ref.dtype)


# ----------------------------------------------------------------------------
# Kernel 2: output projection, tiled over the vocabulary (parallel grid).
# ----------------------------------------------------------------------------
def logits_kernel(last_ref, emb_ref, logit_ref):
    """last_ref : (B, H)   bf16,   emb_ref : (TV, E) bf16 (untransposed tile)
       logit_ref: (B, TV)  f32 = last @ emb_tile^T  (contract hidden dims)."""
    logit_ref[...] = lax.dot_general(
        last_ref[...], emb_ref[...],
        dimension_numbers=(((1,), (1,)), ((), ())),
        preferred_element_type=jnp.float32).astype(logit_ref.dtype)


def _pick_v_tile(v, target=2048):
    """Largest vocab tile <= target that is a multiple of 128 and divides V;
    falls back to a single full block (always legal) otherwise."""
    if v <= target or v % 128 != 0:
        return v
    tv = (min(target, v) // 128) * 128
    while tv > 0 and v % tv != 0:
        tv -= 128
    return tv if tv > 0 else v


# ----------------------------------------------------------------------------
# Wrapper
# ----------------------------------------------------------------------------
def gru4rec_forward(item_ids, hidden, input_len, params):
    """item_ids: (B, T) int32, hidden: (1, B, H) f32, input_len: (B,) int32."""
    emb_f32 = params["emb"]                          # (V, E)
    V, E = emb_f32.shape
    H = params["w_hh"].shape[1]                      # w_hh: (3H, H)
    B, T = item_ids.shape

    # --- glue (plain JAX): bf16 weights + time-major gather ------------------
    emb_bf16 = emb_f32.astype(jnp.bfloat16)          # shared embedding table
    x = emb_bf16[item_ids.T]                         # (T, B, E) gathered time-major
    wih_t = params["w_ih"].T.astype(jnp.bfloat16)    # (E, 3H)
    whh_t = params["w_hh"].T.astype(jnp.bfloat16)    # (H, 3H)
    b_ih, b_hh = params["b_ih"], params["b_hh"]
    # pre-combined r/z biases; n gate keeps b_in here and b_hn separately
    bias = jnp.concatenate(
        [b_ih[:2 * H] + b_hh[:2 * H], b_ih[2 * H:]])[None, :]   # (1, 3H) f32
    b_hn = b_hh[2 * H:][None, :]                                # (1, H)  f32
    lens = input_len.astype(jnp.int32)[:, None]                 # (B, 1)

    vmem = pl.BlockSpec(memory_space=pltpu.MemorySpace.VMEM)

    # --- recurrence: one un-gridded call, everything small & VMEM-resident ---
    h_n, last_bf16 = pl.pallas_call(
        gru_recurrence_kernel,
        out_shape=(
            jax.ShapeDtypeStruct((1, B, H), jnp.float32),
            jax.ShapeDtypeStruct((B, H), jnp.bfloat16),
        ),
        in_specs=[vmem] * 7,
        out_specs=(vmem, vmem),
    )(x, hidden, wih_t, whh_t, bias, b_hn, lens)

    # --- logits: vocab-tiled, pipelined, parallel across TensorCores ---------
    tv = _pick_v_tile(V)
    logit = pl.pallas_call(
        logits_kernel,
        out_shape=jax.ShapeDtypeStruct((B, V), jnp.float32),
        grid=(V // tv,),
        in_specs=[
            pl.BlockSpec((B, H), lambda j: (0, 0)),
            pl.BlockSpec((tv, E), lambda j: (j, 0)),   # untransposed emb tile
        ],
        out_specs=pl.BlockSpec((B, tv), lambda j: (0, j)),
        compiler_params=pltpu.CompilerParams(
            dimension_semantics=("parallel",),
            vmem_limit_bytes=64 * 1024 * 1024),
    )(last_bf16, emb_bf16)
    return logit, h_n


def init_params(key, input_size, embedding_dim, hidden_size):
    """Deterministic parameter init (PyTorch-style uniform for GRU weights)."""
    k_emb, k_wih, k_whh, k_bih, k_bhh = jax.random.split(key, 5)
    bound = 1.0 / jnp.sqrt(hidden_size)
    return {
        "emb": jax.random.normal(k_emb, (input_size, embedding_dim), jnp.float32),
        "w_ih": jax.random.uniform(k_wih, (3 * hidden_size, embedding_dim),
                                   jnp.float32, -bound, bound),
        "w_hh": jax.random.uniform(k_whh, (3 * hidden_size, hidden_size),
                                   jnp.float32, -bound, bound),
        "b_ih": jax.random.uniform(k_bih, (3 * hidden_size,),
                                   jnp.float32, -bound, bound),
        "b_hh": jax.random.uniform(k_bhh, (3 * hidden_size,),
                                   jnp.float32, -bound, bound),
    }
    # TODO(synk): h2o Linear and final_activation are constructed in __init__
    # but never used in the reference forward(), so they are omitted here.


if __name__ == "__main__":
    # small shapes consistent with the module
    B = 8          # batch_size
    T = 8          # window_size / max sequence length
    V = 64         # input_size == output_size (shared embedding)
    E = H = 32     # embedding_dim == hidden_size (required by shared embedding)
    NUM_LAYERS = 1

    key = jax.random.PRNGKey(0)
    k_params, k_ids = jax.random.split(key)

    params = init_params(k_params, V, E, H)

    item_ids = jax.random.randint(k_ids, (B, T), 0, V, dtype=jnp.int32)
    # pack_padded_sequence expects lengths sorted in decreasing order
    input_len = jnp.array([8, 8, 8, 7, 6, 5, 4, 3], dtype=jnp.int32)
    hidden0 = jnp.zeros((NUM_LAYERS, B, H), dtype=jnp.float32)  # init_hidden()

    logit, h_n = gru4rec_forward(item_ids, hidden0, input_len, params)
    jax.block_until_ready((logit, h_n))

    assert logit.shape == (B, V) and h_n.shape == (NUM_LAYERS, B, H)
    print("KERNEL_OK")
</pallas_src>

<mosaic_0001>
module attributes {stable_mosaic.version = 11 : i64} {
  func.func @gru_recurrence_kernel(%arg0: memref<8x8x32xbf16, #tpu.memory_space<vmem>>, %arg1: memref<1x8x32xf32, #tpu.memory_space<vmem>>, %arg2: memref<32x96xbf16, #tpu.memory_space<vmem>>, %arg3: memref<32x96xbf16, #tpu.memory_space<vmem>>, %arg4: memref<1x96xf32, #tpu.memory_space<vmem>>, %arg5: memref<1x32xf32, #tpu.memory_space<vmem>>, %arg6: memref<8x1xi32, #tpu.memory_space<vmem>>, %arg7: memref<1x8x32xf32, #tpu.memory_space<vmem>>, %arg8: memref<8x32xbf16, #tpu.memory_space<vmem>>) attributes {dimension_semantics = [], scalar_prefetch = 0 : i64, scratch_operands = 0 : i64, tpu.core_type = #tpu.core_type<tc>} {
    %c0 = arith.constant 0 : index
    %c0_0 = arith.constant 0 : index
    %0 = vector.load %arg6[%c0, %c0_0] : memref<8x1xi32, #tpu.memory_space<vmem>>, vector<8x1xi32>
    %c0_1 = arith.constant 0 : index
    %c0_2 = arith.constant 0 : index
    %c0_3 = arith.constant 0 : index
    %1 = vector.load %arg0[%c0_1, %c0_2, %c0_3] : memref<8x8x32xbf16, #tpu.memory_space<vmem>>, vector<8x8x32xbf16>
    %2 = vector.shape_cast %1 : vector<8x8x32xbf16> to vector<64x32xbf16>
    %c0_4 = arith.constant 0 : index
    %c0_5 = arith.constant 0 : index
    %3 = vector.load %arg2[%c0_4, %c0_5] : memref<32x96xbf16, #tpu.memory_space<vmem>>, vector<32x96xbf16>
    %cst = arith.constant dense<0.000000e+00> : vector<64x96xf32>
    %4 = tpu.matmul %2, %3, %cst {dimension_numbers = #tpu.dot_dimension_numbers<[1], [0], [0], [1], [0, 0, 1, 1], [], []>} : vector<64x32xbf16>, vector<32x96xbf16>, vector<64x96xf32> -> vector<64x96xf32>
    %c0_6 = arith.constant 0 : index
    %c0_7 = arith.constant 0 : index
    %5 = vector.load %arg4[%c0_6, %c0_7] : memref<1x96xf32, #tpu.memory_space<vmem>>, vector<1x96xf32>
    %6 = vector.broadcast %5 : vector<1x96xf32> to vector<64x96xf32>
    %7 = arith.addf %4, %6 : vector<64x96xf32>
    %c0_8 = arith.constant 0 : index
    %c0_9 = arith.constant 0 : index
    %8 = vector.load %arg5[%c0_8, %c0_9] : memref<1x32xf32, #tpu.memory_space<vmem>>, vector<1x32xf32>
    %c0_10 = arith.constant 0 : index
    %c0_11 = arith.constant 0 : index
    %c0_12 = arith.constant 0 : index
    %9 = vector.load %arg1[%c0_10, %c0_11, %c0_12] : memref<1x8x32xf32, #tpu.memory_space<vmem>>, vector<1x8x32xf32>
    %10 = vector.shape_cast %9 : vector<1x8x32xf32> to vector<8x32xf32>
    %11 = vector.extract_strided_slice %7 {offsets = [0, 0], sizes = [8, 96], strides = [1, 1]} : vector<64x96xf32> to vector<8x96xf32>
    %12 = arith.truncf %10 : vector<8x32xf32> to vector<8x32xbf16>
    %c0_13 = arith.constant 0 : index
    %c0_14 = arith.constant 0 : index
    %13 = vector.load %arg3[%c0_13, %c0_14] : memref<32x96xbf16, #tpu.memory_space<vmem>>, vector<32x96xbf16>
    %cst_15 = arith.constant dense<0.000000e+00> : vector<8x96xf32>
    %14 = tpu.matmul %12, %13, %cst_15 {dimension_numbers = #tpu.dot_dimension_numbers<[1], [0], [0], [1], [0, 0, 1, 1], [], []>} : vector<8x32xbf16>, vector<32x96xbf16>, vector<8x96xf32> -> vector<8x96xf32>
    %15 = vector.extract_strided_slice %11 {offsets = [0, 0], sizes = [8, 32], strides = [1, 1]} : vector<8x96xf32> to vector<8x32xf32>
    %16 = vector.extract_strided_slice %11 {offsets = [0, 32], sizes = [8, 32], strides = [1, 1]} : vector<8x96xf32> to vector<8x32xf32>
    %17 = vector.extract_strided_slice %11 {offsets = [0, 64], sizes = [8, 32], strides = [1, 1]} : vector<8x96xf32> to vector<8x32xf32>
    %18 = vector.extract_strided_slice %14 {offsets = [0, 0], sizes = [8, 32], strides = [1, 1]} : vector<8x96xf32> to vector<8x32xf32>
    %19 = vector.extract_strided_slice %14 {offsets = [0, 32], sizes = [8, 32], strides = [1, 1]} : vector<8x96xf32> to vector<8x32xf32>
    %20 = vector.extract_strided_slice %14 {offsets = [0, 64], sizes = [8, 32], strides = [1, 1]} : vector<8x96xf32> to vector<8x32xf32>
    %21 = arith.addf %15, %18 : vector<8x32xf32>
    %22 = arith.negf %21 : vector<8x32xf32>
    %23 = math.exp %22 : vector<8x32xf32>
    %cst_16 = arith.constant 1.000000e+00 : f32
    %24 = vector.broadcast %cst_16 : f32 to vector<8x32xf32>
    %25 = arith.addf %24, %23 : vector<8x32xf32>
    %26 = arith.divf %24, %25 : vector<8x32xf32>
    %27 = arith.addf %16, %19 : vector<8x32xf32>
    %28 = arith.negf %27 : vector<8x32xf32>
    %29 = math.exp %28 : vector<8x32xf32>
    %cst_17 = arith.constant 1.000000e+00 : f32
    %30 = vector.broadcast %cst_17 : f32 to vector<8x32xf32>
    %31 = arith.addf %30, %29 : vector<8x32xf32>
    %32 = arith.divf %30, %31 : vector<8x32xf32>
    %33 = vector.broadcast %8 : vector<1x32xf32> to vector<8x32xf32>
    %34 = arith.addf %20, %33 : vector<8x32xf32>
    %35 = arith.mulf %26, %34 : vector<8x32xf32>
    %36 = arith.addf %17, %35 : vector<8x32xf32>
    %37 = math.tanh %36 : vector<8x32xf32>
    %cst_18 = arith.constant 1.000000e+00 : f32
    %38 = vector.broadcast %cst_18 : f32 to vector<8x32xf32>
    %39 = arith.subf %38, %32 : vector<8x32xf32>
    %40 = arith.mulf %39, %37 : vector<8x32xf32>
    %41 = arith.mulf %32, %10 : vector<8x32xf32>
    %42 = arith.addf %40, %41 : vector<8x32xf32>
    %c0_i32 = arith.constant 0 : i32
    %43 = vector.broadcast %c0_i32 : i32 to vector<8x1xi32>
    %44 = arith.cmpi sgt, %0, %43 : vector<8x1xi32>
    %45 = vector.shape_cast %44 : vector<8x1xi1> to vector<8x1xi1>
    %46 = vector.broadcast %45 : vector<8x1xi1> to vector<8x32xi1>
    %47 = arith.select %46, %42, %10 : vector<8x32xi1>, vector<8x32xf32>
    %48 = vector.extract_strided_slice %7 {offsets = [8, 0], sizes = [8, 96], strides = [1, 1]} : vector<64x96xf32> to vector<8x96xf32>
    %49 = arith.truncf %47 : vector<8x32xf32> to vector<8x32xbf16>
    %c0_19 = arith.constant 0 : index
    %c0_20 = arith.constant 0 : index
    %50 = vector.load %arg3[%c0_19, %c0_20] : memref<32x96xbf16, #tpu.memory_space<vmem>>, vector<32x96xbf16>
    %cst_21 = arith.constant dense<0.000000e+00> : vector<8x96xf32>
    %51 = tpu.matmul %49, %50, %cst_21 {dimension_numbers = #tpu.dot_dimension_numbers<[1], [0], [0], [1], [0, 0, 1, 1], [], []>} : vector<8x32xbf16>, vector<32x96xbf16>, vector<8x96xf32> -> vector<8x96xf32>
    %52 = vector.extract_strided_slice %48 {offsets = [0, 0], sizes = [8, 32], strides = [1, 1]} : vector<8x96xf32> to vector<8x32xf32>
    %53 = vector.extract_strided_slice %48 {offsets = [0, 32], sizes = [8, 32], strides = [1, 1]} : vector<8x96xf32> to vector<8x32xf32>
    %54 = vector.extract_strided_slice %48 {offsets = [0, 64], sizes = [8, 32], strides = [1, 1]} : vector<8x96xf32> to vector<8x32xf32>
    %55 = vector.extract_strided_slice %51 {offsets = [0, 0], sizes = [8, 32], strides = [1, 1]} : vector<8x96xf32> to vector<8x32xf32>
    %56 = vector.extract_strided_slice %51 {offsets = [0, 32], sizes = [8, 32], strides = [1, 1]} : vector<8x96xf32> to vector<8x32xf32>
    %57 = vector.extract_strided_slice %51 {offsets = [0, 64], sizes = [8, 32], strides = [1, 1]} : vector<8x96xf32> to vector<8x32xf32>
    %58 = arith.addf %52, %55 : vector<8x32xf32>
    %59 = arith.negf %58 : vector<8x32xf32>
    %60 = math.exp %59 : vector<8x32xf32>
    %cst_22 = arith.constant 1.000000e+00 : f32
    %61 = vector.broadcast %cst_22 : f32 to vector<8x32xf32>
    %62 = arith.addf %61, %60 : vector<8x32xf32>
    %63 = arith.divf %61, %62 : vector<8x32xf32>
    %64 = arith.addf %53, %56 : vector<8x32xf32>
    %65 = arith.negf %64 : vector<8x32xf32>
    %66 = math.exp %65 : vector<8x32xf32>
    %cst_23 = arith.constant 1.000000e+00 : f32
    %67 = vector.broadcast %cst_23 : f32 to vector<8x32xf32>
    %68 = arith.addf %67, %66 : vector<8x32xf32>
    %69 = arith.divf %67, %68 : vector<8x32xf32>
    %70 = vector.broadcast %8 : vector<1x32xf32> to vector<8x32xf32>
    %71 = arith.addf %57, %70 : vector<8x32xf32>
    %72 = arith.mulf %63, %71 : vector<8x32xf32>
    %73 = arith.addf %54, %72 : vector<8x32xf32>
    %74 = math.tanh %73 : vector<8x32xf32>
    %cst_24 = arith.constant 1.000000e+00 : f32
    %75 = vector.broadcast %cst_24 : f32 to vector<8x32xf32>
    %76 = arith.subf %75, %69 : vector<8x32xf32>
    %77 = arith.mulf %76, %74 : vector<8x32xf32>
    %78 = arith.mulf %69, %47 : vector<8x32xf32>
    %79 = arith.addf %77, %78 : vector<8x32xf32>
    %c1_i32 = arith.constant 1 : i32
    %80 = vector.broadcast %c1_i32 : i32 to vector<8x1xi32>
    %81 = arith.cmpi sgt, %0, %80 : vector<8x1xi32>
    %82 = vector.shape_cast %81 : vector<8x1xi1> to vector<8x1xi1>
    %83 = vector.broadcast %82 : vector<8x1xi1> to vector<8x32xi1>
    %84 = arith.select %83, %79, %47 : vector<8x32xi1>, vector<8x32xf32>
    %85 = vector.extract_strided_slice %7 {offsets = [16, 0], sizes = [8, 96], strides = [1, 1]} : vector<64x96xf32> to vector<8x96xf32>
    %86 = arith.truncf %84 : vector<8x32xf32> to vector<8x32xbf16>
    %c0_25 = arith.constant 0 : index
    %c0_26 = arith.constant 0 : index
    %87 = vector.load %arg3[%c0_25, %c0_26] : memref<32x96xbf16, #tpu.memory_space<vmem>>, vector<32x96xbf16>
    %cst_27 = arith.constant dense<0.000000e+00> : vector<8x96xf32>
    %88 = tpu.matmul %86, %87, %cst_27 {dimension_numbers = #tpu.dot_dimension_numbers<[1], [0], [0], [1], [0, 0, 1, 1], [], []>} : vector<8x32xbf16>, vector<32x96xbf16>, vector<8x96xf32> -> vector<8x96xf32>
    %89 = vector.extract_strided_slice %85 {offsets = [0, 0], sizes = [8, 32], strides = [1, 1]} : vector<8x96xf32> to vector<8x32xf32>
    %90 = vector.extract_strided_slice %85 {offsets = [0, 32], sizes = [8, 32], strides = [1, 1]} : vector<8x96xf32> to vector<8x32xf32>
    %91 = vector.extract_strided_slice %85 {offsets = [0, 64], sizes = [8, 32], strides = [1, 1]} : vector<8x96xf32> to vector<8x32xf32>
    %92 = vector.extract_strided_slice %88 {offsets = [0, 0], sizes = [8, 32], strides = [1, 1]} : vector<8x96xf32> to vector<8x32xf32>
    %93 = vector.extract_strided_slice %88 {offsets = [0, 32], sizes = [8, 32], strides = [1, 1]} : vector<8x96xf32> to vector<8x32xf32>
    %94 = vector.extract_strided_slice %88 {offsets = [0, 64], sizes = [8, 32], strides = [1, 1]} : vector<8x96xf32> to vector<8x32xf32>
    %95 = arith.addf %89, %92 : vector<8x32xf32>
    %96 = arith.negf %95 : vector<8x32xf32>
    %97 = math.exp %96 : vector<8x32xf32>
    %cst_28 = arith.constant 1.000000e+00 : f32
    %98 = vector.broadcast %cst_28 : f32 to vector<8x32xf32>
    %99 = arith.addf %98, %97 : vector<8x32xf32>
    %100 = arith.divf %98, %99 : vector<8x32xf32>
    %101 = arith.addf %90, %93 : vector<8x32xf32>
    %102 = arith.negf %101 : vector<8x32xf32>
    %103 = math.exp %102 : vector<8x32xf32>
    %cst_29 = arith.constant 1.000000e+00 : f32
    %104 = vector.broadcast %cst_29 : f32 to vector<8x32xf32>
    %105 = arith.addf %104, %103 : vector<8x32xf32>
    %106 = arith.divf %104, %105 : vector<8x32xf32>
    %107 = vector.broadcast %8 : vector<1x32xf32> to vector<8x32xf32>
    %108 = arith.addf %94, %107 : vector<8x32xf32>
    %109 = arith.mulf %100, %108 : vector<8x32xf32>
    %110 = arith.addf %91, %109 : vector<8x32xf32>
    %111 = math.tanh %110 : vector<8x32xf32>
    %cst_30 = arith.constant 1.000000e+00 : f32
    %112 = vector.broadcast %cst_30 : f32 to vector<8x32xf32>
    %113 = arith.subf %112, %106 : vector<8x32xf32>
    %114 = arith.mulf %113, %111 : vector<8x32xf32>
    %115 = arith.mulf %106, %84 : vector<8x32xf32>
    %116 = arith.addf %114, %115 : vector<8x32xf32>
    %c2_i32 = arith.constant 2 : i32
    %117 = vector.broadcast %c2_i32 : i32 to vector<8x1xi32>
    %118 = arith.cmpi sgt, %0, %117 : vector<8x1xi32>
    %119 = vector.shape_cast %118 : vector<8x1xi1> to vector<8x1xi1>
    %120 = vector.broadcast %119 : vector<8x1xi1> to vector<8x32xi1>
    %121 = arith.select %120, %116, %84 : vector<8x32xi1>, vector<8x32xf32>
    %122 = vector.extract_strided_slice %7 {offsets = [24, 0], sizes = [8, 96], strides = [1, 1]} : vector<64x96xf32> to vector<8x96xf32>
    %123 = arith.truncf %121 : vector<8x32xf32> to vector<8x32xbf16>
    %c0_31 = arith.constant 0 : index
    %c0_32 = arith.constant 0 : index
    %124 = vector.load %arg3[%c0_31, %c0_32] : memref<32x96xbf16, #tpu.memory_space<vmem>>, vector<32x96xbf16>
    %cst_33 = arith.constant dense<0.000000e+00> : vector<8x96xf32>
    %125 = tpu.matmul %123, %124, %cst_33 {dimension_numbers = #tpu.dot_dimension_numbers<[1], [0], [0], [1], [0, 0, 1, 1], [], []>} : vector<8x32xbf16>, vector<32x96xbf16>, vector<8x96xf32> -> vector<8x96xf32>
    %126 = vector.extract_strided_slice %122 {offsets = [0, 0], sizes = [8, 32], strides = [1, 1]} : vector<8x96xf32> to vector<8x32xf32>
    %127 = vector.extract_strided_slice %122 {offsets = [0, 32], sizes = [8, 32], strides = [1, 1]} : vector<8x96xf32> to vector<8x32xf32>
    %128 = vector.extract_strided_slice %122 {offsets = [0, 64], sizes = [8, 32], strides = [1, 1]} : vector<8x96xf32> to vector<8x32xf32>
    %129 = vector.extract_strided_slice %125 {offsets = [0, 0], sizes = [8, 32], strides = [1, 1]} : vector<8x96xf32> to vector<8x32xf32>
    %130 = vector.extract_strided_slice %125 {offsets = [0, 32], sizes = [8, 32], strides = [1, 1]} : vector<8x96xf32> to vector<8x32xf32>
    %131 = vector.extract_strided_slice %125 {offsets = [0, 64], sizes = [8, 32], strides = [1, 1]} : vector<8x96xf32> to vector<8x32xf32>
    %132 = arith.addf %126, %129 : vector<8x32xf32>
    %133 = arith.negf %132 : vector<8x32xf32>
    %134 = math.exp %133 : vector<8x32xf32>
    %cst_34 = arith.constant 1.000000e+00 : f32
    %135 = vector.broadcast %cst_34 : f32 to vector<8x32xf32>
    %136 = arith.addf %135, %134 : vector<8x32xf32>
    %137 = arith.divf %135, %136 : vector<8x32xf32>
    %138 = arith.addf %127, %130 : vector<8x32xf32>
    %139 = arith.negf %138 : vector<8x32xf32>
    %140 = math.exp %139 : vector<8x32xf32>
    %cst_35 = arith.constant 1.000000e+00 : f32
    %141 = vector.broadcast %cst_35 : f32 to vector<8x32xf32>
    %142 = arith.addf %141, %140 : vector<8x32xf32>
    %143 = arith.divf %141, %142 : vector<8x32xf32>
    %144 = vector.broadcast %8 : vector<1x32xf32> to vector<8x32xf32>
    %145 = arith.addf %131, %144 : vector<8x32xf32>
    %146 = arith.mulf %137, %145 : vector<8x32xf32>
    %147 = arith.addf %128, %146 : vector<8x32xf32>
    %148 = math.tanh %147 : vector<8x32xf32>
    %cst_36 = arith.constant 1.000000e+00 : f32
    %149 = vector.broadcast %cst_36 : f32 to vector<8x32xf32>
    %150 = arith.subf %149, %143 : vector<8x32xf32>
    %151 = arith.mulf %150, %148 : vector<8x32xf32>
    %152 = arith.mulf %143, %121 : vector<8x32xf32>
    %153 = arith.addf %151, %152 : vector<8x32xf32>
    %c3_i32 = arith.constant 3 : i32
    %154 = vector.broadcast %c3_i32 : i32 to vector<8x1xi32>
    %155 = arith.cmpi sgt, %0, %154 : vector<8x1xi32>
    %156 = vector.shape_cast %155 : vector<8x1xi1> to vector<8x1xi1>
    %157 = vector.broadcast %156 : vector<8x1xi1> to vector<8x32xi1>
    %158 = arith.select %157, %153, %121 : vector<8x32xi1>, vector<8x32xf32>
    %159 = vector.extract_strided_slice %7 {offsets = [32, 0], sizes = [8, 96], strides = [1, 1]} : vector<64x96xf32> to vector<8x96xf32>
    %160 = arith.truncf %158 : vector<8x32xf32> to vector<8x32xbf16>
    %c0_37 = arith.constant 0 : index
    %c0_38 = arith.constant 0 : index
    %161 = vector.load %arg3[%c0_37, %c0_38] : memref<32x96xbf16, #tpu.memory_space<vmem>>, vector<32x96xbf16>
    %cst_39 = arith.constant dense<0.000000e+00> : vector<8x96xf32>
    %162 = tpu.matmul %160, %161, %cst_39 {dimension_numbers = #tpu.dot_dimension_numbers<[1], [0], [0], [1], [0, 0, 1, 1], [], []>} : vector<8x32xbf16>, vector<32x96xbf16>, vector<8x96xf32> -> vector<8x96xf32>
    %163 = vector.extract_strided_slice %159 {offsets = [0, 0], sizes = [8, 32], strides = [1, 1]} : vector<8x96xf32> to vector<8x32xf32>
    %164 = vector.extract_strided_slice %159 {offsets = [0, 32], sizes = [8, 32], strides = [1, 1]} : vector<8x96xf32> to vector<8x32xf32>
    %165 = vector.extract_strided_slice %159 {offsets = [0, 64], sizes = [8, 32], strides = [1, 1]} : vector<8x96xf32> to vector<8x32xf32>
    %166 = vector.extract_strided_slice %162 {offsets = [0, 0], sizes = [8, 32], strides = [1, 1]} : vector<8x96xf32> to vector<8x32xf32>
    %167 = vector.extract_strided_slice %162 {offsets = [0, 32], sizes = [8, 32], strides = [1, 1]} : vector<8x96xf32> to vector<8x32xf32>
    %168 = vector.extract_strided_slice %162 {offsets = [0, 64], sizes = [8, 32], strides = [1, 1]} : vector<8x96xf32> to vector<8x32xf32>
    %169 = arith.addf %163, %166 : vector<8x32xf32>
    %170 = arith.negf %169 : vector<8x32xf32>
    %171 = math.exp %170 : vector<8x32xf32>
    %cst_40 = arith.constant 1.000000e+00 : f32
    %172 = vector.broadcast %cst_40 : f32 to vector<8x32xf32>
    %173 = arith.addf %172, %171 : vector<8x32xf32>
    %174 = arith.divf %172, %173 : vector<8x32xf32>
    %175 = arith.addf %164, %167 : vector<8x32xf32>
    %176 = arith.negf %175 : vector<8x32xf32>
    %177 = math.exp %176 : vector<8x32xf32>
    %cst_41 = arith.constant 1.000000e+00 : f32
    %178 = vector.broadcast %cst_41 : f32 to vector<8x32xf32>
    %179 = arith.addf %178, %177 : vector<8x32xf32>
    %180 = arith.divf %178, %179 : vector<8x32xf32>
    %181 = vector.broadcast %8 : vector<1x32xf32> to vector<8x32xf32>
    %182 = arith.addf %168, %181 : vector<8x32xf32>
    %183 = arith.mulf %174, %182 : vector<8x32xf32>
    %184 = arith.addf %165, %183 : vector<8x32xf32>
    %185 = math.tanh %184 : vector<8x32xf32>
    %cst_42 = arith.constant 1.000000e+00 : f32
    %186 = vector.broadcast %cst_42 : f32 to vector<8x32xf32>
    %187 = arith.subf %186, %180 : vector<8x32xf32>
    %188 = arith.mulf %187, %185 : vector<8x32xf32>
    %189 = arith.mulf %180, %158 : vector<8x32xf32>
    %190 = arith.addf %188, %189 : vector<8x32xf32>
    %c4_i32 = arith.constant 4 : i32
    %191 = vector.broadcast %c4_i32 : i32 to vector<8x1xi32>
    %192 = arith.cmpi sgt, %0, %191 : vector<8x1xi32>
    %193 = vector.shape_cast %192 : vector<8x1xi1> to vector<8x1xi1>
    %194 = vector.broadcast %193 : vector<8x1xi1> to vector<8x32xi1>
    %195 = arith.select %194, %190, %158 : vector<8x32xi1>, vector<8x32xf32>
    %196 = vector.extract_strided_slice %7 {offsets = [40, 0], sizes = [8, 96], strides = [1, 1]} : vector<64x96xf32> to vector<8x96xf32>
    %197 = arith.truncf %195 : vector<8x32xf32> to vector<8x32xbf16>
    %c0_43 = arith.constant 0 : index
    %c0_44 = arith.constant 0 : index
    %198 = vector.load %arg3[%c0_43, %c0_44] : memref<32x96xbf16, #tpu.memory_space<vmem>>, vector<32x96xbf16>
    %cst_45 = arith.constant dense<0.000000e+00> : vector<8x96xf32>
    %199 = tpu.matmul %197, %198, %cst_45 {dimension_numbers = #tpu.dot_dimension_numbers<[1], [0], [0], [1], [0, 0, 1, 1], [], []>} : vector<8x32xbf16>, vector<32x96xbf16>, vector<8x96xf32> -> vector<8x96xf32>
    %200 = vector.extract_strided_slice %196 {offsets = [0, 0], sizes = [8, 32], strides = [1, 1]} : vector<8x96xf32> to vector<8x32xf32>
    %201 = vector.extract_strided_slice %196 {offsets = [0, 32], sizes = [8, 32], strides = [1, 1]} : vector<8x96xf32> to vector<8x32xf32>
    %202 = vector.extract_strided_slice %196 {offsets = [0, 64], sizes = [8, 32], strides = [1, 1]} : vector<8x96xf32> to vector<8x32xf32>
    %203 = vector.extract_strided_slice %199 {offsets = [0, 0], sizes = [8, 32], strides = [1, 1]} : vector<8x96xf32> to vector<8x32xf32>
    %204 = vector.extract_strided_slice %199 {offsets = [0, 32], sizes = [8, 32], strides = [1, 1]} : vector<8x96xf32> to vector<8x32xf32>
    %205 = vector.extract_strided_slice %199 {offsets = [0, 64], sizes = [8, 32], strides = [1, 1]} : vector<8x96xf32> to vector<8x32xf32>
    %206 = arith.addf %200, %203 : vector<8x32xf32>
    %207 = arith.negf %206 : vector<8x32xf32>
    %208 = math.exp %207 : vector<8x32xf32>
    %cst_46 = arith.constant 1.000000e+00 : f32
    %209 = vector.broadcast %cst_46 : f32 to vector<8x32xf32>
    %210 = arith.addf %209, %208 : vector<8x32xf32>
    %211 = arith.divf %209, %210 : vector<8x32xf32>
    %212 = arith.addf %201, %204 : vector<8x32xf32>
    %213 = arith.negf %212 : vector<8x32xf32>
    %214 = math.exp %213 : vector<8x32xf32>
    %cst_47 = arith.constant 1.000000e+00 : f32
    %215 = vector.broadcast %cst_47 : f32 to vector<8x32xf32>
    %216 = arith.addf %215, %214 : vector<8x32xf32>
    %217 = arith.divf %215, %216 : vector<8x32xf32>
    %218 = vector.broadcast %8 : vector<1x32xf32> to vector<8x32xf32>
    %219 = arith.addf %205, %218 : vector<8x32xf32>
    %220 = arith.mulf %211, %219 : vector<8x32xf32>
    %221 = arith.addf %202, %220 : vector<8x32xf32>
    %222 = math.tanh %221 : vector<8x32xf32>
    %cst_48 = arith.constant 1.000000e+00 : f32
    %223 = vector.broadcast %cst_48 : f32 to vector<8x32xf32>
    %224 = arith.subf %223, %217 : vector<8x32xf32>
    %225 = arith.mulf %224, %222 : vector<8x32xf32>
    %226 = arith.mulf %217, %195 : vector<8x32xf32>
    %227 = arith.addf %225, %226 : vector<8x32xf32>
    %c5_i32 = arith.constant 5 : i32
    %228 = vector.broadcast %c5_i32 : i32 to vector<8x1xi32>
    %229 = arith.cmpi sgt, %0, %228 : vector<8x1xi32>
    %230 = vector.shape_cast %229 : vector<8x1xi1> to vector<8x1xi1>
    %231 = vector.broadcast %230 : vector<8x1xi1> to vector<8x32xi1>
    %232 = arith.select %231, %227, %195 : vector<8x32xi1>, vector<8x32xf32>
    %233 = vector.extract_strided_slice %7 {offsets = [48, 0], sizes = [8, 96], strides = [1, 1]} : vector<64x96xf32> to vector<8x96xf32>
    %234 = arith.truncf %232 : vector<8x32xf32> to vector<8x32xbf16>
    %c0_49 = arith.constant 0 : index
    %c0_50 = arith.constant 0 : index
    %235 = vector.load %arg3[%c0_49, %c0_50] : memref<32x96xbf16, #tpu.memory_space<vmem>>, vector<32x96xbf16>
    %cst_51 = arith.constant dense<0.000000e+00> : vector<8x96xf32>
    %236 = tpu.matmul %234, %235, %cst_51 {dimension_numbers = #tpu.dot_dimension_numbers<[1], [0], [0], [1], [0, 0, 1, 1], [], []>} : vector<8x32xbf16>, vector<32x96xbf16>, vector<8x96xf32> -> vector<8x96xf32>
    %237 = vector.extract_strided_slice %233 {offsets = [0, 0], sizes = [8, 32], strides = [1, 1]} : vector<8x96xf32> to vector<8x32xf32>
    %238 = vector.extract_strided_slice %233 {offsets = [0, 32], sizes = [8, 32], strides = [1, 1]} : vector<8x96xf32> to vector<8x32xf32>
    %239 = vector.extract_strided_slice %233 {offsets = [0, 64], sizes = [8, 32], strides = [1, 1]} : vector<8x96xf32> to vector<8x32xf32>
    %240 = vector.extract_strided_slice %236 {offsets = [0, 0], sizes = [8, 32], strides = [1, 1]} : vector<8x96xf32> to vector<8x32xf32>
    %241 = vector.extract_strided_slice %236 {offsets = [0, 32], sizes = [8, 32], strides = [1, 1]} : vector<8x96xf32> to vector<8x32xf32>
    %242 = vector.extract_strided_slice %236 {offsets = [0, 64], sizes = [8, 32], strides = [1, 1]} : vector<8x96xf32> to vector<8x32xf32>
    %243 = arith.addf %237, %240 : vector<8x32xf32>
    %244 = arith.negf %243 : vector<8x32xf32>
    %245 = math.exp %244 : vector<8x32xf32>
    %cst_52 = arith.constant 1.000000e+00 : f32
    %246 = vector.broadcast %cst_52 : f32 to vector<8x32xf32>
    %247 = arith.addf %246, %245 : vector<8x32xf32>
    %248 = arith.divf %246, %247 : vector<8x32xf32>
    %249 = arith.addf %238, %241 : vector<8x32xf32>
    %250 = arith.negf %249 : vector<8x32xf32>
    %251 = math.exp %250 : vector<8x32xf32>
    %cst_53 = arith.constant 1.000000e+00 : f32
    %252 = vector.broadcast %cst_53 : f32 to vector<8x32xf32>
    %253 = arith.addf %252, %251 : vector<8x32xf32>
    %254 = arith.divf %252, %253 : vector<8x32xf32>
    %255 = vector.broadcast %8 : vector<1x32xf32> to vector<8x32xf32>
    %256 = arith.addf %242, %255 : vector<8x32xf32>
    %257 = arith.mulf %248, %256 : vector<8x32xf32>
    %258 = arith.addf %239, %257 : vector<8x32xf32>
    %259 = math.tanh %258 : vector<8x32xf32>
    %cst_54 = arith.constant 1.000000e+00 : f32
    %260 = vector.broadcast %cst_54 : f32 to vector<8x32xf32>
    %261 = arith.subf %260, %254 : vector<8x32xf32>
    %262 = arith.mulf %261, %259 : vector<8x32xf32>
    %263 = arith.mulf %254, %232 : vector<8x32xf32>
    %264 = arith.addf %262, %263 : vector<8x32xf32>
    %c6_i32 = arith.constant 6 : i32
    %265 = vector.broadcast %c6_i32 : i32 to vector<8x1xi32>
    %266 = arith.cmpi sgt, %0, %265 : vector<8x1xi32>
    %267 = vector.shape_cast %266 : vector<8x1xi1> to vector<8x1xi1>
    %268 = vector.broadcast %267 : vector<8x1xi1> to vector<8x32xi1>
    %269 = arith.select %268, %264, %232 : vector<8x32xi1>, vector<8x32xf32>
    %270 = vector.extract_strided_slice %7 {offsets = [56, 0], sizes = [8, 96], strides = [1, 1]} : vector<64x96xf32> to vector<8x96xf32>
    %271 = arith.truncf %269 : vector<8x32xf32> to vector<8x32xbf16>
    %c0_55 = arith.constant 0 : index
    %c0_56 = arith.constant 0 : index
    %272 = vector.load %arg3[%c0_55, %c0_56] : memref<32x96xbf16, #tpu.memory_space<vmem>>, vector<32x96xbf16>
    %cst_57 = arith.constant dense<0.000000e+00> : vector<8x96xf32>
    %273 = tpu.matmul %271, %272, %cst_57 {dimension_numbers = #tpu.dot_dimension_numbers<[1], [0], [0], [1], [0, 0, 1, 1], [], []>} : vector<8x32xbf16>, vector<32x96xbf16>, vector<8x96xf32> -> vector<8x96xf32>
    %274 = vector.extract_strided_slice %270 {offsets = [0, 0], sizes = [8, 32], strides = [1, 1]} : vector<8x96xf32> to vector<8x32xf32>
    %275 = vector.extract_strided_slice %270 {offsets = [0, 32], sizes = [8, 32], strides = [1, 1]} : vector<8x96xf32> to vector<8x32xf32>
    %276 = vector.extract_strided_slice %270 {offsets = [0, 64], sizes = [8, 32], strides = [1, 1]} : vector<8x96xf32> to vector<8x32xf32>
    %277 = vector.extract_strided_slice %273 {offsets = [0, 0], sizes = [8, 32], strides = [1, 1]} : vector<8x96xf32> to vector<8x32xf32>
    %278 = vector.extract_strided_slice %273 {offsets = [0, 32], sizes = [8, 32], strides = [1, 1]} : vector<8x96xf32> to vector<8x32xf32>
    %279 = vector.extract_strided_slice %273 {offsets = [0, 64], sizes = [8, 32], strides = [1, 1]} : vector<8x96xf32> to vector<8x32xf32>
    %280 = arith.addf %274, %277 : vector<8x32xf32>
    %281 = arith.negf %280 : vector<8x32xf32>
    %282 = math.exp %281 : vector<8x32xf32>
    %cst_58 = arith.constant 1.000000e+00 : f32
    %283 = vector.broadcast %cst_58 : f32 to vector<8x32xf32>
    %284 = arith.addf %283, %282 : vector<8x32xf32>
    %285 = arith.divf %283, %284 : vector<8x32xf32>
    %286 = arith.addf %275, %278 : vector<8x32xf32>
    %287 = arith.negf %286 : vector<8x32xf32>
    %288 = math.exp %287 : vector<8x32xf32>
    %cst_59 = arith.constant 1.000000e+00 : f32
    %289 = vector.broadcast %cst_59 : f32 to vector<8x32xf32>
    %290 = arith.addf %289, %288 : vector<8x32xf32>
    %291 = arith.divf %289, %290 : vector<8x32xf32>
    %292 = vector.broadcast %8 : vector<1x32xf32> to vector<8x32xf32>
    %293 = arith.addf %279, %292 : vector<8x32xf32>
    %294 = arith.mulf %285, %293 : vector<8x32xf32>
    %295 = arith.addf %276, %294 : vector<8x32xf32>
    %296 = math.tanh %295 : vector<8x32xf32>
    %cst_60 = arith.constant 1.000000e+00 : f32
    %297 = vector.broadcast %cst_60 : f32 to vector<8x32xf32>
    %298 = arith.subf %297, %291 : vector<8x32xf32>
    %299 = arith.mulf %298, %296 : vector<8x32xf32>
    %300 = arith.mulf %291, %269 : vector<8x32xf32>
    %301 = arith.addf %299, %300 : vector<8x32xf32>
    %c7_i32 = arith.constant 7 : i32
    %302 = vector.broadcast %c7_i32 : i32 to vector<8x1xi32>
    %303 = arith.cmpi sgt, %0, %302 : vector<8x1xi32>
    %304 = vector.shape_cast %303 : vector<8x1xi1> to vector<8x1xi1>
    %305 = vector.broadcast %304 : vector<8x1xi1> to vector<8x32xi1>
    %306 = arith.select %305, %301, %269 : vector<8x32xi1>, vector<8x32xf32>
    %c0_61 = arith.constant 0 : index
    %c0_62 = arith.constant 0 : index
    %c0_63 = arith.constant 0 : index
    %307 = vector.load %arg7[%c0_61, %c0_62, %c0_63] : memref<1x8x32xf32, #tpu.memory_space<vmem>>, vector<1x8x32xf32>
    %308 = vector.shape_cast %307 : vector<1x8x32xf32> to vector<8x32xf32>
    %309 = vector.shape_cast %306 : vector<8x32xf32> to vector<1x8x32xf32>
    tpu.vector_store %arg7[%c0_61, %c0_62, %c0_63], %309 {strides = array<i32>} : memref<1x8x32xf32, #tpu.memory_space<vmem>>, vector<1x8x32xf32>,
    %c8_i32 = arith.constant 8 : i32
    %310 = vector.broadcast %c8_i32 : i32 to vector<8x1xi32>
    %311 = arith.cmpi eq, %0, %310 : vector<8x1xi32>
    %cst_64 = arith.constant 0.000000e+00 : f32
    %312 = vector.broadcast %cst_64 : f32 to vector<8x32xf32>
    %313 = vector.shape_cast %311 : vector<8x1xi1> to vector<8x1xi1>
    %314 = vector.broadcast %313 : vector<8x1xi1> to vector<8x32xi1>
    %315 = arith.select %314, %306, %312 : vector<8x32xi1>, vector<8x32xf32>
    %316 = arith.truncf %315 : vector<8x32xf32> to vector<8x32xbf16>
    %c0_65 = arith.constant 0 : index
    %c0_66 = arith.constant 0 : index
    %317 = vector.load %arg8[%c0_65, %c0_66] : memref<8x32xbf16, #tpu.memory_space<vmem>>, vector<8x32xbf16>
    tpu.vector_store %arg8[%c0_65, %c0_66], %316 {strides = array<i32>} : memref<8x32xbf16, #tpu.memory_space<vmem>>, vector<8x32xbf16>,
    return
  }
}

</mosaic_0001>

<bundles_post_ra>
// kernel: tpu_custom_call.1
= control target key start
LH: loop header
LB: loop body
LE: loop exit
PB: predicated region body
PF: predicated region fallthrough
CT: control target
= control target key end

     0   :  { %14 = vsyncpa [#allocation3], 0  ;;  %s1493_s0 = inlined_call_operand.hbm [shape: bf16[8,8,32], index: 0, kind: input, shape index: {}]   ;;  %s1494_s1 = inlined_call_operand.vmem [shape: f32[1,8,32], index: 1, kind: input, shape index: {}]   ;;  %s1495_s2 = inlined_call_operand.hbm [shape: bf16[32,96], index: 2, kind: input, shape index: {}]   ;;  %s1496_s3 = inlined_call_operand.hbm [shape: bf16[32,96], index: 3, kind: input, shape index: {}]   ;;  %s1497_s4 = inlined_call_operand.vmem [shape: f32[1,96], index: 4, kind: input, shape index: {}]   ;;  %s1498_s5 = inlined_call_operand.vmem [shape: f32[1,32], index: 5, kind: input, shape index: {}]   ;;  %s1499_s6 = inlined_call_operand.vmem [shape: s32[8,1], index: 6, kind: input, shape index: {}]   ;;  %s1500_s7 = inlined_call_operand.hbm [shape: f32[1,8,32], index: 7, kind: output, shape index: {0}]   ;;  %s1501_s8 = inlined_call_operand.hbm [shape: bf16[8,32], index: 8, kind: output, shape index: {1}]  }
   0x1   :  { %15 = vsyncpa [#allocation6], 0 }
   0x2   :  { %16 = vsyncpa [#allocation4], 0 }
   0x3   :  { %17 = vsyncpa [#allocation10], 0  ;;  %s1244_s27 = smov [#allocation5]   ;;  %s1245_s29 = smov [#allocation2]  }
   0x4   :  { %s37_s28 = sshll.u32 %s1244_s27, 4  ;;  %s23_s30 = sshll.u32 %s1245_s29, 4  ;;  %s38_s28 = int_to_ptr.vmem [resolvable:$true] %s37_s28  ;;  %s24_s30 = int_to_ptr.vmem [resolvable:$true] %s23_s30 }
   0x5   :  { %s1144_s9 = scalar_lea.vmem %s38_s28, 256  ;;  %p1149_p1 = scmp.lt.s32.totalorder %s38_s28, %s38_s28 }
   0x6   :  { %p1145_p0 = scmp.ne.s32.totalorder %s38_s28, %s1144_s9  ;;  %p1150_p2 = scmp.lt.s32.totalorder %s1144_s9, %s1144_s9 }
   0x8   :  { %p1151_p3 = por %p1150_p2, %p1149_p1 }
   0xa   :  { %p1152_p4 = pnand %p1151_p3, %p1145_p0 }
   0xc   :  { %1155 = shalt.err (!%p1152_p4)
}
   0xd   :  { %s1246_s10 = smov 64   ;;  %s1247_s11 = smov 4  }
   0xe   :  { %43 = dma.hbm_to_vmem [thread:$0]  %s1495_s2, 256, %s38_s28, [#allocation6], %s1246_s10, %s1246_s10, %s1247_s11  }
   0xf   :  { %s1164_s14 = scalar_lea.vmem %s24_s30, 512  ;;  %p1169_p6 = scmp.lt.s32.totalorder %s24_s30, %s24_s30 }
  0x10   :  { %p1165_p5 = scmp.ne.s32.totalorder %s24_s30, %s1164_s14  ;;  %p1170_p7 = scmp.lt.s32.totalorder %s1164_s14, %s1164_s14 }
  0x12   :  { %p1171_p8 = por %p1170_p7, %p1169_p6 }
  0x14   :  { %p1172_p9 = pnand %p1171_p8, %p1165_p5 }
  0x16   :  { %1175 = shalt.err (!%p1172_p9)
}
  0x17   :  { %29 = dma.hbm_to_vmem [thread:$0]  %s1493_s0, 512, %s24_s30, [#allocation3], %s1246_s10, %s1246_s10, %s1247_s11  }
  0x18   :  { %s1248_s17 = smov [#allocation7]  }
  0x19   :  { %s49_s18 = sshll.u32 %s1248_s17, 4  ;;  %s50_s18 = int_to_ptr.vmem [resolvable:$true] %s49_s18 }
  0x1a   :  { %s1184_s19 = scalar_lea.vmem %s50_s18, 256  ;;  %p1189_p11 = scmp.lt.s32.totalorder %s50_s18, %s50_s18 }
  0x1b   :  { %p1185_p10 = scmp.ne.s32.totalorder %s50_s18, %s1184_s19  ;;  %p1190_p12 = scmp.lt.s32.totalorder %s1184_s19, %s1184_s19 }
  0x1d   :  { %p1191_p13 = por %p1190_p12, %p1189_p11 }
  0x1f   :  { %p1192_p0 = pnand %p1191_p13, %p1185_p10 }
  0x21   :  { %1195 = shalt.err (!%p1192_p0)
}
  0x22   :  { %55 = dma.hbm_to_vmem [thread:$0]  %s1496_s3, 256, %s50_s18, [#allocation6], %s1246_s10, %s1246_s10, %s1247_s11  }
  0x23   :  { %1236 = dma.done.wait [#allocation3], 512  }
  0x24   :  { %1237 = vsyncadd [#allocation3], 4294966784 }
  0x25   :  { %1238 = dma.done.wait [#allocation6], 512  }
  0x26   :  { %1239 = vsyncadd [#allocation6], 4294966784  ;;  %v1249_v0 = vmov 0.0   ;;  %vm1250_vm0 = vmmov 0   ;;  %v1080_v1 = vld [vmem:[#allocation5 + $0x8] sm:$0xff]   ;;  %v1319_v2 = vld [vmem:[#allocation7 + $0x8] sm:$0xff]  }
  0x27   :  { %1002 = vmatprep.subr.bf16.mxu1 %v1249_v0  ;;  %1006 = vmatprep.mubr.msk.bf16.mxu1 %vm1250_vm0, %v1249_v0  ;;  %v1082_v3 = vld [vmem:[#allocation5] sm:$0xff]   ;;  %v1322_v4 = vld [vmem:[#allocation7] sm:$0xff]   ;;  %vm124_vm1 = vcmask 261120   ;;  %v1085_v8 = vld [vmem:[#allocation2 + $0x8] sm:$0xff]   ;;  %v1251_v10 = vmov 0   ;;  %s1253_s25 = smov 96  }
  0x28   :  { %990 = vmatprep.subr.bf16.mxu0 %v1080_v1  ;;  %1003 = vmatpush3.bf16.msra.mxu1 %v1319_v2  ;;  %v1084_v5 = vld [vmem:[#allocation2] sm:$0xff]   ;;  %v1086_v61 = vld [vmem:[#allocation2 + $0x10] sm:$0xff]   ;;  %v1087_v62 = vld [vmem:[#allocation2 + $0x18] sm:$0xff]   ;;  %s1255_s27 = smov [#allocation9]  }
  0x29   :  { %991 = vmatpush3.bf16.msra.mxu0 %v1080_v1  ;;  %1004 = vmatprep.subr.bf16.mxu1 %v1249_v0  ;;  %v203_v6 = vld [vmem:[%s1494_s1] sm:$0xff]  ;;  %s914_s28 = sshll.u32 %s1255_s27, 4  ;;  %s915_s28 = int_to_ptr.vmem [resolvable:$true] %s914_s28 }
  0x2a   :  { %992 = vmatprep.subr.bf16.mxu0 %v1082_v3  ;;  %994 = vmatprep.mubr.msk.bf16.mxu0 %vm124_vm1, %v1084_v5  ;;  %v204_v7 = vpack.c.bf16 %v203_v6, %v203_v6  ;;  %v943_v9 = vld [vmem:[%s1498_s5] ss:$0 sm:$0xff] }
  0x2b   :  { %276 = vrot.lane.b32.xlu0 %v943_v9, %s1246_s10  ;;  %1078 = vset.pattern.permute.xlu1 %v1251_v10  ;;  %v1359_v18 = vld [vmem:[%s1497_s4] ss:$0 sm:$0xff]  ;;  %s1252_s4 = smov 32  }
  0x2c   :  { %1005 = vmatpush3.bf16.msra.mxu1 %v1322_v4  ;;  %1079 = vset.pattern.permute.xlu0 %v1251_v10  ;;  %v1365_v25 = vld [vmem:[%s1499_s6] sm:$0xff]  ;;  %s1254_s6 = smov [#allocation8]  }
  0x2d   :  { %993 = vmatpush3.bf16.msra.mxu0 %v1082_v3  ;;  %1010 = vmatprep.subr.bf16.mxu1 %v1249_v0  ;;  %vm303_vm2 = vcmp.gt.s32.totalorder %v1365_v25, 0  ;;  %vm384_vm4 = vcmp.gt.s32.totalorder %v1365_v25, 1  ;;  %vm465_vm6 = vcmp.gt.s32.totalorder %v1365_v25, 2  ;;  %vm546_vm8 = vcmp.gt.s32.totalorder %v1365_v25, 3  ;;  %s904_s26 = sshll.u32 %s1254_s6, 4  ;;  %s905_s26 = int_to_ptr.vmem [resolvable:$true] %s904_s26 }
  0x2e   :  { %1018 = vmatprep.subr.bf16.mxu0 %v1249_v0  ;;  %v304_v29 = vsel %vm303_vm2, 1, %v1251_v10  ;;  %v385_v47 = vsel %vm384_vm4, 1, %v1251_v10  ;;  %vm627_vm10 = vcmp.gt.s32.totalorder %v1365_v25, 4  ;;  %vm708_vm12 = vcmp.gt.s32.totalorder %v1365_v25, 5  ;;  %s1196_s29 = scalar_lea.vmem %s905_s26, 128  ;;  %p1201_p2 = scmp.lt.s32.totalorder %s905_s26, %s905_s26 }
  0x2f   :  { %1007 = vmatmul.mubr.msk.bf16.vlgmr.msra.gmra.mxu1 %vm124_vm1, %v204_v7  ;;  %vm789_vm14 = vcmp.gt.s32.totalorder %v1365_v25, 6  ;;  %vm882_vm2 = vcmp.eq.s32.totalorder %v1365_v25, 8  ;;  %p1197_p1 = scmp.ne.s32.totalorder %s905_s26, %s1196_s29  ;;  %p1202_p3 = scmp.lt.s32.totalorder %s1196_s29, %s1196_s29 }
  0x30   :  { %995 = vmatmul.mubr.msk.bf16.vlgmr.msra.gmra.mxu0 %vm124_vm1, %v1085_v8  ;;  %1011 = vmatpush3.bf16.msra.mxu1 %v1319_v2 }
  0x31   :  { %1014 = vmatprep.mubr.msk.bf16.mxu1 %vm1250_vm0, %v1249_v0  ;;  %1012 = vmatprep.subr.bf16.mxu1 %v1249_v0  ;;  %p1203_p4 = por %p1202_p3, %p1201_p2 }
  0x32   :  { %1019 = vmatpush3.bf16.msra.mxu0 %v1319_v2  ;;  %998 = vmatprep.mubr.msk.bf16.mxu0 %vm124_vm1, %v1086_v61 }
  0x33   :  { %1020 = vmatprep.subr.bf16.mxu0 %v1249_v0  ;;  %p1204_p5 = pnand %p1203_p4, %p1197_p1 }
  0x34   :  { %1013 = vmatpush3.bf16.msra.mxu1 %v1322_v4 }
  0x35   :  { %1026 = vmatprep.subr.bf16.mxu1 %v1249_v0 }
  0x36   :  { %1021 = vmatpush3.bf16.msra.mxu0 %v1322_v4 }
  0x37   :  { %1034 = vmatprep.subr.bf16.mxu0 %v1249_v0 }
  0x38   :  { %999 = vmatmul.mubr.msk.bf16.gmra.mxu0 %vm124_vm1, %v1087_v62 }
  0x39   :  { %1022 = vmatprep.mubr.msk.bf16.mxu0 %vm1250_vm0, %v1249_v0 }
  0x9d   :  { %v1350_v11 = vpop.permute.xlu0 %276 }
  0xef   :  { %v258_v12 = vpop.f32.mrf.mxu1 }
  0xf0   :  { %v279_v13 = vadd.f32 %v1350_v11, %v258_v12  ;;  %v1354_v17 = vpop.f32.mrf.mxu0 }
  0xf1   :  { %v1008_v14 = vpop.f32.mrf.mxu1 }
  0xf2   :  { %281 = vrot.lane.b32.xlu0 %v279_v13, %s1246_s10  ;;  %v171_v19 = vpop.f32.mrf.mxu0 }
  0xf3   :  { %v261_v15 = vpop.f32.mrf.mxu1  ;;  %v172_v20 = vadd.f32 %v1359_v18, %v171_v19 }
  0xf4   :  { %v1383_v49 = vpop.f32.mrf.mxu0 }
  0xf5   :  { %v1009_v16 = vpop.f32.mrf.mxu1  ;;  %v264_v21 = vadd.f32 %v258_v12, %v172_v20 }
  0xf6   :  { %v174_v50 = vpop.f32.mrf.mxu0 }
  0xf7   :  { %v942_v22 = vmul.f32 -1.442695, %v264_v21  ;;  %v175_v51 = vadd.f32 %v1359_v18, %v174_v50 }
  0xf8   :  { %v1400_v14 = vpop.f32.mrf.mxu0 }
  0xf9   :  { %1088 = vpow2.f32 %v942_v22 }
  0xfa   :  { %v1402_v15 = vpop.f32.mrf.mxu0 }
  0xfc   :  { %v1404_v16 = vpop.f32.mrf.mxu0 }
  0xfe   :  { %v1406_v19 = vpop.f32.mrf.mxu0 }
 0x106   :  { %v1089_v23 = vpop.eup %1088 }
 0x107   :  { %v268_v24 = vadd.f32 1.0, %v1089_v23 }
 0x109   :  { %1090 = vrcp.f32 %v268_v24 }
 0x116   :  { %v1091_v26 = vpop.eup %1090 }
 0x117   :  { %v291_v35 = vsub.f32 1.0, %v1091_v26 }
 0x164   :  { %v282_v27 = vpop.permute.xlu0 %281 }
 0x165   :  { %v284_v28 = vmul.f32 %v1091_v26, %v282_v27 }
 0x167   :  { %286 = vrot.lane.b32.xlu1 %v284_v28, %s1246_s10 }
 0x16b   :  { %306 = vperm.xlu1 %1078, %v304_v29  }
 0x16f   :  { %298 = vrot.lane.b32.xlu1 %v203_v6, %s1252_s4 }
 0x1d9   :  { %v287_v30 = vpop.permute.xlu1 %286 }
 0x1da   :  { %v289_v31 = vadd.f32 %v287_v30, %v172_v20 }
 0x1dc   :  { %1092 = vtanh.f32 %v289_v31  ;;  %v466_v31 = vsel %vm465_vm6, 1, %v1251_v10 }
 0x1e6   :  { %v307_v33 = vpop.permute.xlu1 %306 }
 0x1e7   :  { %vm308_vm3 = vcmp.eq.s32.totalorder %v307_v33, 1 }
 0x1e9   :  { %v1093_v32 = vpop.eup %1092 }
 0x1ea   :  { %293 = vrot.lane.b32.xlu0 %v1093_v32, %s1253_s25  ;;  %v299_v34 = vpop.permute.xlu1 %298 }
 0x1eb   :  { %v301_v37 = vmul.f32 %v1091_v26, %v299_v34  ;;  %v180_v26 = vadd.f32 %v1354_v17, %v1359_v18 }
 0x25c   :  { %v294_v36 = vpop.permute.xlu0 %293 }
 0x25d   :  { %v296_v38 = vmul.f32 %v294_v36, %v291_v35 }
 0x25f   :  { %v302_v39 = vadd.f32 %v301_v37, %v296_v38 }
 0x261   :  { %v309_v40 = vsel %vm308_vm3, %v302_v39, %v299_v34 }
 0x262   :  { %v310_v41 = vpack.c.bf16 %v309_v40, %v309_v40 }
 0x264   :  { %312 = vrot.lane.b32.xlu0 %v310_v41, %s1253_s25 }
 0x2d6   :  { %v313_v42 = vpop.permute.xlu0 %312 }
 0x2d7   :  { %1015 = vmatmul.mubr.msk.bf16.vlgmr.msra.gmra.mxu1 %vm124_vm1, %v313_v42 }
 0x2d8   :  { %1027 = vmatpush3.bf16.msra.mxu1 %v1319_v2  ;;  %1030 = vmatprep.mubr.msk.bf16.mxu1 %vm1250_vm0, %v1249_v0 }
 0x2d9   :  { %1028 = vmatprep.subr.bf16.mxu1 %v1249_v0 }
 0x2dc   :  { %1029 = vmatpush3.bf16.msra.mxu1 %v1322_v4 }
 0x2dd   :  { %1042 = vmatprep.subr.bf16.mxu1 %v1249_v0 }
 0x397   :  { %v351_v43 = vpop.f32.mrf.mxu1 }
 0x398   :  { %v364_v44 = vadd.f32 %v351_v43, %v1350_v11  ;;  %v357_v52 = vadd.f32 %v351_v43, %v175_v51 }
 0x399   :  { %v1016_v45 = vpop.f32.mrf.mxu1 }
 0x39a   :  { %366 = vrot.lane.b32.xlu1 %v364_v44, %s1246_s10  ;;  %v945_v53 = vmul.f32 -1.442695, %v357_v52 }
 0x39b   :  { %v354_v46 = vpop.f32.mrf.mxu1 }
 0x39c   :  { %1094 = vpow2.f32 %v945_v53  ;;  %v183_v53 = vadd.f32 %v1383_v49, %v1359_v18 }
 0x39d   :  { %v1017_v48 = vpop.f32.mrf.mxu1 }
 0x39e   :  { %387 = vperm.xlu1 %1078, %v385_v47  }
 0x3a9   :  { %v1095_v54 = vpop.eup %1094 }
 0x3aa   :  { %v361_v55 = vadd.f32 1.0, %v1095_v54 }
 0x3ac   :  { %1096 = vrcp.f32 %v361_v55 }
 0x3b9   :  { %v1097_v56 = vpop.eup %1096 }
 0x3ba   :  { %v376_v1 = vsub.f32 1.0, %v1097_v56  ;;  %v382_v6 = vmul.f32 %v1097_v56, %v309_v40 }
 0x40c   :  { %v367_v57 = vpop.permute.xlu1 %366 }
 0x40d   :  { %v369_v58 = vmul.f32 %v1097_v56, %v367_v57 }
 0x40f   :  { %371 = vrot.lane.b32.xlu0 %v369_v58, %s1246_s10 }
 0x419   :  { %v388_v5 = vpop.permute.xlu1 %387 }
 0x41a   :  { %vm389_vm5 = vcmp.eq.s32.totalorder %v388_v5, 1 }
 0x481   :  { %v372_v59 = vpop.permute.xlu0 %371 }
 0x482   :  { %v374_v60 = vadd.f32 %v372_v59, %v175_v51  ;;  %v547_v51 = vsel %vm546_vm8, 1, %v1251_v10 }
 0x484   :  { %1098 = vtanh.f32 %v374_v60 }
 0x491   :  { %v1099_v63 = vpop.eup %1098 }
 0x492   :  { %378 = vrot.lane.b32.xlu0 %v1099_v63, %s1253_s25 }
 0x504   :  { %v379_v3 = vpop.permute.xlu0 %378 }
 0x505   :  { %v381_v7 = vmul.f32 %v379_v3, %v376_v1 }
 0x507   :  { %v383_v8 = vadd.f32 %v382_v6, %v381_v7 }
 0x509   :  { %v390_v9 = vsel %vm389_vm5, %v383_v8, %v309_v40  ;;  %vm896_vm5 = vcmask 257024  }
 0x50a   :  { %v391_v12 = vpack.c.bf16 %v390_v9, %v390_v9 }
 0x50c   :  { %393 = vrot.lane.b32.xlu1 %v391_v12, %s1253_s25 }
 0x57e   :  { %v394_v13 = vpop.permute.xlu1 %393 }
 0x57f   :  { %1023 = vmatmul.mubr.msk.bf16.vlgmr.msra.gmra.mxu0 %vm124_vm1, %v394_v13 }
 0x580   :  { %1035 = vmatpush3.bf16.msra.mxu0 %v1319_v2  ;;  %1038 = vmatprep.mubr.msk.bf16.mxu0 %vm1250_vm0, %v1249_v0 }
 0x581   :  { %1036 = vmatprep.subr.bf16.mxu0 %v1249_v0 }
 0x584   :  { %1037 = vmatpush3.bf16.msra.mxu0 %v1322_v4 }
 0x585   :  { %1050 = vmatprep.subr.bf16.mxu0 %v1249_v0 }
 0x63f   :  { %v432_v20 = vpop.f32.mrf.mxu0 }
 0x640   :  { %v445_v21 = vadd.f32 %v432_v20, %v1350_v11  ;;  %v438_v27 = vadd.f32 %v432_v20, %v180_v26 }
 0x641   :  { %v1024_v22 = vpop.f32.mrf.mxu0 }
 0x642   :  { %447 = vrot.lane.b32.xlu0 %v445_v21, %s1246_s10  ;;  %v947_v28 = vmul.f32 -1.442695, %v438_v27 }
 0x643   :  { %v435_v23 = vpop.f32.mrf.mxu0 }
 0x644   :  { %1100 = vpow2.f32 %v947_v28  ;;  %v628_v23 = vsel %vm627_vm10, 1, %v1251_v10 }
 0x645   :  { %v1025_v24 = vpop.f32.mrf.mxu0 }
 0x646   :  { %468 = vperm.xlu0 %1079, %v466_v31  }
 0x651   :  { %v1101_v29 = vpop.eup %1100 }
 0x652   :  { %v442_v30 = vadd.f32 1.0, %v1101_v29 }
 0x654   :  { %1102 = vrcp.f32 %v442_v30 }
 0x661   :  { %v1103_v32 = vpop.eup %1102 }
 0x662   :  { %v457_v37 = vsub.f32 1.0, %v1103_v32  ;;  %v463_v40 = vmul.f32 %v1103_v32, %v390_v9 }
 0x6b4   :  { %v448_v33 = vpop.permute.xlu0 %447 }
 0x6b5   :  { %v450_v34 = vmul.f32 %v1103_v32, %v448_v33 }
 0x6b7   :  { %452 = vrot.lane.b32.xlu1 %v450_v34, %s1246_s10 }
 0x6c1   :  { %v469_v38 = vpop.permute.xlu0 %468 }
 0x6c2   :  { %vm470_vm7 = vcmp.eq.s32.totalorder %v469_v38, 1 }
 0x729   :  { %v453_v35 = vpop.permute.xlu1 %452 }
 0x72a   :  { %v455_v36 = vadd.f32 %v453_v35, %v180_v26  ;;  %v188_v26 = vadd.f32 %v1359_v18, %v1402_v15 }
 0x72c   :  { %1104 = vtanh.f32 %v455_v36 }
 0x739   :  { %v1105_v17 = vpop.eup %1104 }
 0x73a   :  { %459 = vrot.lane.b32.xlu1 %v1105_v17, %s1253_s25 }
 0x7ac   :  { %v460_v39 = vpop.permute.xlu1 %459 }
 0x7ad   :  { %v462_v41 = vmul.f32 %v460_v39, %v457_v37 }
 0x7af   :  { %v464_v42 = vadd.f32 %v463_v40, %v462_v41 }
 0x7b1   :  { %v471_v43 = vsel %vm470_vm7, %v464_v42, %v390_v9 }
 0x7b2   :  { %v472_v44 = vpack.c.bf16 %v471_v43, %v471_v43 }
 0x7b4   :  { %474 = vrot.lane.b32.xlu1 %v472_v44, %s1253_s25 }
 0x826   :  { %v475_v45 = vpop.permute.xlu1 %474 }
 0x827   :  { %1031 = vmatmul.mubr.msk.bf16.vlgmr.msra.gmra.mxu1 %vm124_vm1, %v475_v45 }
 0x828   :  { %1043 = vmatpush3.bf16.msra.mxu1 %v1319_v2  ;;  %1046 = vmatprep.mubr.msk.bf16.mxu1 %vm1250_vm0, %v1249_v0 }
 0x829   :  { %1044 = vmatprep.subr.bf16.mxu1 %v1249_v0 }
 0x82c   :  { %1045 = vmatpush3.bf16.msra.mxu1 %v1322_v4 }
 0x82d   :  { %1058 = vmatprep.subr.bf16.mxu1 %v1249_v0 }
 0x8e7   :  { %v513_v46 = vpop.f32.mrf.mxu1 }
 0x8e8   :  { %v526_v47 = vadd.f32 %v513_v46, %v1350_v11  ;;  %v519_v54 = vadd.f32 %v513_v46, %v183_v53 }
 0x8e9   :  { %v1032_v48 = vpop.f32.mrf.mxu1 }
 0x8ea   :  { %528 = vrot.lane.b32.xlu0 %v526_v47, %s1246_s10  ;;  %v949_v55 = vmul.f32 -1.442695, %v519_v54  ;;  %v709_v48 = vsel %vm708_vm12, 1, %v1251_v10 }
 0x8eb   :  { %v516_v50 = vpop.f32.mrf.mxu1 }
 0x8ec   :  { %1106 = vpow2.f32 %v949_v55 }
 0x8ed   :  { %v1033_v52 = vpop.f32.mrf.mxu1 }
 0x8ee   :  { %549 = vperm.xlu0 %1079, %v547_v51  }
 0x8f9   :  { %v1107_v56 = vpop.eup %1106 }
 0x8fa   :  { %v523_v57 = vadd.f32 1.0, %v1107_v56 }
 0x8fc   :  { %1108 = vrcp.f32 %v523_v57 }
 0x909   :  { %v1109_v58 = vpop.eup %1108 }
 0x90a   :  { %v538_v1 = vsub.f32 1.0, %v1109_v58  ;;  %v544_v5 = vmul.f32 %v1109_v58, %v471_v43 }
 0x95c   :  { %v529_v59 = vpop.permute.xlu0 %528 }
 0x95d   :  { %v531_v60 = vmul.f32 %v1109_v58, %v529_v59 }
 0x95f   :  { %533 = vrot.lane.b32.xlu1 %v531_v60, %s1246_s10 }
 0x969   :  { %v550_v49 = vpop.permute.xlu0 %549 }
 0x96a   :  { %vm551_vm9 = vcmp.eq.s32.totalorder %v550_v49, 1 }
 0x9d1   :  { %v534_v61 = vpop.permute.xlu1 %533 }
 0x9d2   :  { %v536_v62 = vadd.f32 %v534_v61, %v183_v53 }
 0x9d4   :  { %1110 = vtanh.f32 %v536_v62 }
 0x9e1   :  { %v1111_v63 = vpop.eup %1110 }
 0x9e2   :  { %540 = vrot.lane.b32.xlu1 %v1111_v63, %s1253_s25 }
 0xa54   :  { %v541_v3 = vpop.permute.xlu1 %540 }
 0xa55   :  { %v543_v6 = vmul.f32 %v541_v3, %v538_v1 }
 0xa57   :  { %v545_v7 = vadd.f32 %v544_v5, %v543_v6 }
 0xa59   :  { %v552_v8 = vsel %vm551_vm9, %v545_v7, %v471_v43 }
 0xa5a   :  { %v553_v9 = vpack.c.bf16 %v552_v8, %v552_v8 }
 0xa5c   :  { %555 = vrot.lane.b32.xlu0 %v553_v9, %s1253_s25  ;;  %v790_v9 = vsel %vm789_vm14, 1, %v1251_v10 }
 0xace   :  { %v556_v12 = vpop.permute.xlu0 %555 }
 0xacf   :  { %1039 = vmatmul.mubr.msk.bf16.vlgmr.msra.gmra.mxu0 %vm124_vm1, %v556_v12 }
 0xad0   :  { %1051 = vmatpush3.bf16.msra.mxu0 %v1319_v2  ;;  %1054 = vmatprep.mubr.msk.bf16.mxu0 %vm1250_vm0, %v1249_v0 }
 0xad1   :  { %1052 = vmatprep.subr.bf16.mxu0 %v1249_v0 }
 0xad4   :  { %1053 = vmatpush3.bf16.msra.mxu0 %v1322_v4 }
 0xb8f   :  { %v594_v13 = vpop.f32.mrf.mxu0 }
 0xb90   :  { %v607_v20 = vadd.f32 %v594_v13, %v1350_v11  ;;  %v600_v27 = vadd.f32 %v594_v13, %v188_v26  ;;  %v196_v13 = vadd.f32 %v1400_v14, %v1359_v18 }
 0xb91   :  { %v1040_v21 = vpop.f32.mrf.mxu0 }
 0xb92   :  { %609 = vrot.lane.b32.xlu1 %v607_v20, %s1246_s10  ;;  %v951_v28 = vmul.f32 -1.442695, %v600_v27 }
 0xb93   :  { %v597_v22 = vpop.f32.mrf.mxu0 }
 0xb94   :  { %1112 = vpow2.f32 %v951_v28 }
 0xb95   :  { %v1041_v24 = vpop.f32.mrf.mxu0 }
 0xb96   :  { %630 = vperm.xlu1 %1078, %v628_v23  }
 0xba1   :  { %v1113_v29 = vpop.eup %1112 }
 0xba2   :  { %v604_v30 = vadd.f32 1.0, %v1113_v29 }
 0xba4   :  { %1114 = vrcp.f32 %v604_v30 }
 0xbb1   :  { %v1115_v31 = vpop.eup %1114 }
 0xbb2   :  { %v619_v17 = vsub.f32 1.0, %v1115_v31  ;;  %v625_v38 = vmul.f32 %v1115_v31, %v552_v8 }
 0xc04   :  { %v610_v32 = vpop.permute.xlu1 %609 }
 0xc05   :  { %v612_v33 = vmul.f32 %v1115_v31, %v610_v32 }
 0xc07   :  { %614 = vrot.lane.b32.xlu0 %v612_v33, %s1246_s10 }
 0xc11   :  { %v631_v15 = vpop.permute.xlu1 %630 }
 0xc12   :  { %vm632_vm11 = vcmp.eq.s32.totalorder %v631_v15, 1 }
 0xc79   :  { %v615_v34 = vpop.permute.xlu0 %614 }
 0xc7a   :  { %v617_v35 = vadd.f32 %v615_v34, %v188_v26 }
 0xc7c   :  { %1116 = vtanh.f32 %v617_v35 }
 0xc89   :  { %v1117_v36 = vpop.eup %1116 }
 0xc8a   :  { %621 = vrot.lane.b32.xlu0 %v1117_v36, %s1253_s25 }
 0xcfc   :  { %v622_v37 = vpop.permute.xlu0 %621 }
 0xcfd   :  { %v624_v39 = vmul.f32 %v622_v37, %v619_v17 }
 0xcff   :  { %v626_v40 = vadd.f32 %v625_v38, %v624_v39 }
 0xd01   :  { %v633_v41 = vsel %vm632_vm11, %v626_v40, %v552_v8 }
 0xd02   :  { %v634_v42 = vpack.c.bf16 %v633_v41, %v633_v41 }
 0xd04   :  { %636 = vrot.lane.b32.xlu1 %v634_v42, %s1253_s25 }
 0xd76   :  { %v637_v43 = vpop.permute.xlu1 %636 }
 0xd77   :  { %1047 = vmatmul.mubr.msk.bf16.vlgmr.msra.gmra.mxu1 %vm124_vm1, %v637_v43  ;;  %v199_v43 = vadd.f32 %v1404_v16, %v1359_v18 }
 0xd78   :  { %1059 = vmatpush3.bf16.msra.mxu1 %v1319_v2  ;;  %1062 = vmatprep.mubr.msk.bf16.mxu1 %vm1250_vm0, %v1249_v0  ;;  %v191_v2 = vadd.f32 %v1359_v18, %v1406_v19  ;;  %vm870_vm0 = vcmp.gt.s32.totalorder %v1365_v25, 7 }
 0xd79   :  { %1060 = vmatprep.subr.bf16.mxu1 %v1249_v0 }
 0xd7c   :  { %1061 = vmatpush3.bf16.msra.mxu1 %v1322_v4 }
 0xe37   :  { %v675_v44 = vpop.f32.mrf.mxu1 }
 0xe38   :  { %v688_v45 = vadd.f32 %v675_v44, %v1350_v11  ;;  %v681_v51 = vadd.f32 %v675_v44, %v191_v2 }
 0xe39   :  { %v1048_v46 = vpop.f32.mrf.mxu1 }
 0xe3a   :  { %690 = vrot.lane.b32.xlu0 %v688_v45, %s1246_s10  ;;  %v953_v0 = vmul.f32 -1.442695, %v681_v51 }
 0xe3b   :  { %v678_v47 = vpop.f32.mrf.mxu1 }
 0xe3c   :  { %1118 = vpow2.f32 %v953_v0 }
 0xe3d   :  { %v1049_v50 = vpop.f32.mrf.mxu1 }
 0xe3e   :  { %711 = vperm.xlu0 %1079, %v709_v48  }
 0xe49   :  { %v1119_v4 = vpop.eup %1118 }
 0xe4a   :  { %v685_v52 = vadd.f32 1.0, %v1119_v4 }
 0xe4c   :  { %1120 = vrcp.f32 %v685_v52 }
 0xe59   :  { %v1121_v53 = vpop.eup %1120 }
 0xe5a   :  { %v700_v59 = vsub.f32 1.0, %v1121_v53  ;;  %v706_v61 = vmul.f32 %v1121_v53, %v633_v41 }
 0xeac   :  { %v691_v54 = vpop.permute.xlu0 %690 }
 0xead   :  { %v693_v55 = vmul.f32 %v1121_v53, %v691_v54 }
 0xeaf   :  { %695 = vrot.lane.b32.xlu1 %v693_v55, %s1246_s10 }
 0xeb9   :  { %v712_v19 = vpop.permute.xlu0 %711 }
 0xeba   :  { %vm713_vm13 = vcmp.eq.s32.totalorder %v712_v19, 1 }
 0xf21   :  { %v696_v56 = vpop.permute.xlu1 %695 }
 0xf22   :  { %v698_v57 = vadd.f32 %v696_v56, %v191_v2  ;;  %v883_v2 = vsel %vm882_vm2, 1, %v1251_v10 }
 0xf24   :  { %1122 = vtanh.f32 %v698_v57 }
 0xf31   :  { %v1123_v58 = vpop.eup %1122 }
 0xf32   :  { %702 = vrot.lane.b32.xlu1 %v1123_v58, %s1253_s25 }
 0xfa4   :  { %v703_v60 = vpop.permute.xlu1 %702 }
 0xfa5   :  { %v705_v62 = vmul.f32 %v703_v60, %v700_v59 }
 0xfa7   :  { %v707_v63 = vadd.f32 %v706_v61, %v705_v62 }
 0xfa9   :  { %v714_v1 = vsel %vm713_vm13, %v707_v63, %v633_v41  ;;  %v871_v41 = vsel %vm870_vm0, 1, %v1251_v10 }
 0xfaa   :  { %v715_v3 = vpack.c.bf16 %v714_v1, %v714_v1 }
 0xfac   :  { %717 = vrot.lane.b32.xlu0 %v715_v3, %s1253_s25 }
0x101e   :  { %v718_v49 = vpop.permute.xlu0 %717 }
0x101f   :  { %1055 = vmatmul.mubr.msk.bf16.vlgmr.msra.gmra.mxu0 %vm124_vm1, %v718_v49 }
0x10df   :  { %v756_v5 = vpop.f32.mrf.mxu0 }
0x10e0   :  { %v769_v6 = vadd.f32 %v756_v5, %v1350_v11  ;;  %v762_v20 = vadd.f32 %v756_v5, %v196_v13 }
0x10e1   :  { %v1056_v7 = vpop.f32.mrf.mxu0 }
0x10e2   :  { %771 = vrot.lane.b32.xlu1 %v769_v6, %s1246_s10  ;;  %v955_v21 = vmul.f32 -1.442695, %v762_v20 }
0x10e3   :  { %v759_v8 = vpop.f32.mrf.mxu0 }
0x10e4   :  { %1124 = vpow2.f32 %v955_v21 }
0x10e5   :  { %v1057_v12 = vpop.f32.mrf.mxu0 }
0x10e6   :  { %792 = vperm.xlu1 %1078, %v790_v9  }
0x10f1   :  { %v1125_v22 = vpop.eup %1124 }
0x10f2   :  { %v766_v23 = vadd.f32 1.0, %v1125_v22 }
0x10f4   :  { %1126 = vrcp.f32 %v766_v23 }
0x1101   :  { %v1127_v24 = vpop.eup %1126 }
0x1102   :  { %v781_v31 = vsub.f32 1.0, %v1127_v24  ;;  %v787_v33 = vmul.f32 %v1127_v24, %v714_v1 }
0x1154   :  { %v772_v26 = vpop.permute.xlu1 %771 }
0x1155   :  { %v774_v27 = vmul.f32 %v1127_v24, %v772_v26 }
0x1157   :  { %776 = vrot.lane.b32.xlu0 %v774_v27, %s1246_s10 }
0x1161   :  { %v793_v14 = vpop.permute.xlu1 %792 }
0x1162   :  { %vm794_vm15 = vcmp.eq.s32.totalorder %v793_v14, 1 }
0x11c9   :  { %v777_v28 = vpop.permute.xlu0 %776 }
0x11ca   :  { %v779_v29 = vadd.f32 %v777_v28, %v196_v13 }
0x11cc   :  { %1128 = vtanh.f32 %v779_v29 }
0x11d9   :  { %v1129_v30 = vpop.eup %1128 }
0x11da   :  { %783 = vrot.lane.b32.xlu0 %v1129_v30, %s1253_s25 }
0x124c   :  { %v784_v32 = vpop.permute.xlu0 %783 }
0x124d   :  { %v786_v34 = vmul.f32 %v784_v32, %v781_v31 }
0x124f   :  { %v788_v35 = vadd.f32 %v787_v33, %v786_v34 }
0x1251   :  { %v795_v36 = vsel %vm794_vm15, %v788_v35, %v714_v1 }
0x1252   :  { %v796_v17 = vpack.c.bf16 %v795_v36, %v795_v36 }
0x1254   :  { %798 = vrot.lane.b32.xlu1 %v796_v17, %s1253_s25 }
0x12c6   :  { %v799_v37 = vpop.permute.xlu1 %798 }
0x12c7   :  { %1063 = vmatmul.mubr.msk.bf16.vlgmr.msra.gmra.mxu1 %vm124_vm1, %v799_v37 }
0x1387   :  { %v837_v15 = vpop.f32.mrf.mxu1 }
0x1388   :  { %v850_v38 = vadd.f32 %v837_v15, %v1350_v11  ;;  %v843_v44 = vadd.f32 %v837_v15, %v199_v43 }
0x1389   :  { %v1064_v39 = vpop.f32.mrf.mxu1 }
0x138a   :  { %852 = vrot.lane.b32.xlu0 %v850_v38, %s1246_s10  ;;  %v957_v45 = vmul.f32 -1.442695, %v843_v44 }
0x138b   :  { %v840_v40 = vpop.f32.mrf.mxu1 }
0x138c   :  { %1130 = vpow2.f32 %v957_v45 }
0x138d   :  { %v1065_v42 = vpop.f32.mrf.mxu1 }
0x138e   :  { %873 = vperm.xlu0 %1079, %v871_v41  }
0x1399   :  { %v1131_v46 = vpop.eup %1130 }
0x139a   :  { %v847_v47 = vadd.f32 1.0, %v1131_v46 }
0x139c   :  { %1132 = vrcp.f32 %v847_v47 }
0x13a9   :  { %v1133_v11 = vpop.eup %1132 }
0x13aa   :  { %v862_v4 = vsub.f32 1.0, %v1133_v11  ;;  %v868_v53 = vmul.f32 %v1133_v11, %v795_v36 }
0x13fc   :  { %v853_v48 = vpop.permute.xlu0 %852 }
0x13fd   :  { %v855_v50 = vmul.f32 %v1133_v11, %v853_v48 }
0x13ff   :  { %857 = vrot.lane.b32.xlu1 %v855_v50, %s1246_s10 }
0x1403   :  { %885 = vperm.xlu1 %1078, %v883_v2  }
0x1409   :  { %v874_v16 = vpop.permute.xlu0 %873 }
0x140a   :  { %vm875_vm3 = vcmp.eq.s32.totalorder %v874_v16, 1 }
0x1471   :  { %v858_v51 = vpop.permute.xlu1 %857 }
0x1472   :  { %v860_v0 = vadd.f32 %v858_v51, %v199_v43 }
0x1474   :  { %1134 = vtanh.f32 %v860_v0 }
0x147e   :  { %v886_v55 = vpop.permute.xlu1 %885 }
0x147f   :  { %vm887_vm4 = vcmp.eq.s32.totalorder %v886_v55, 1 }
0x1481   :  { %v1135_v18 = vpop.eup %1134 }
0x1482   :  { %864 = vrot.lane.b32.xlu0 %v1135_v18, %s1253_s25 }
0x14f4   :  { %v865_v52 = vpop.permute.xlu0 %864 }
0x14f5   :  { %v867_v54 = vmul.f32 %v865_v52, %v862_v4 }
0x14f7   :  { %v869_v56 = vadd.f32 %v868_v53, %v867_v54 }
0x14f9   :  { %v876_v25 = vsel %vm875_vm3, %v869_v56, %v795_v36 }
0x14fa   :  { %878 = vrot.lane.b32.xlu1 %v876_v25, %s1253_s25  ;;  %v888_v10 = vsel %vm887_vm4, %v876_v25, 0.0 }
0x14fb   :  { %v959_v57 = vpack.c.bf16 %v888_v10, %v888_v10 }
0x14fd   :  { %893 = vrot.lane.b32.xlu0 %v959_v57, %s1253_s25 }
0x156c   :  { %v879_v58 = vpop.permute.xlu1 %878 }
0x156d   :  { %881 = vst.msk [vmem:[#allocation8] sm:$0xff] %vm124_vm1, %v879_v58 }
0x156e   :  { %1207 = shalt.err (!%p1204_p5)
}
0x156f   :  { %907 = dma.vmem_to_hbm [thread:$0]  %s905_s26, 128, %s1500_s7, [#allocation4]   ;;  %v894_v59 = vpop.permute.xlu0 %893 }
0x1570   :  { %897 = vst.msk [vmem:[#allocation9] sm:$0xf] %vm896_vm5, %v894_v59  ;;  %s1216_s10 = scalar_lea.vmem %s915_s28, 64  ;;  %p1221_p7 = scmp.lt.s32.totalorder %s915_s28, %s915_s28 }
0x1571   :  { %p1217_p6 = scmp.ne.s32.totalorder %s915_s28, %s1216_s10  ;;  %p1222_p8 = scmp.lt.s32.totalorder %s1216_s10, %s1216_s10 }
0x1573   :  { %p1223_p9 = por %p1222_p8, %p1221_p7 }
0x1575   :  { %p1224_p10 = pnand %p1223_p9, %p1217_p6 }
0x1577   :  { %1227 = shalt.err (!%p1224_p10)
}
0x1578   :  { %917 = dma.vmem_to_hbm [thread:$0]  %s915_s28, 64, %s1501_s8, [#allocation10]  }
0x1579   :  { %1240 = dma.done.wait [#allocation4], 128  }
0x157a   :  { %1241 = vsyncadd [#allocation4], 4294967168 }
0x157b   :  { %1242 = dma.done.wait [#allocation10], 64  }
0x157c   :  { %1243 = vsyncadd [#allocation10], 4294967232 }
0x157d   :  { %924 = vsyncpa [#allocation3], 1 }
0x157e   :  { %925 = vsyncpa [#allocation6], 1 }
0x157f   :  { %926 = vsyncpa [#allocation4], 1 }
0x1580   :  { %927 = vsyncpa [#allocation10], 1 }

</bundles_post_ra>
